<compile_context>
chip_gen: v6e
topology: v6e:2x2x1
jax: 0.10.0
libtpu: 0.0.40
codegen_flags: <defaults>
</compile_context>

<pallas_src>
import functools

import jax
import jax.numpy as jnp
from jax.experimental import pallas as pl
from jax.experimental.pallas import tpu as pltpu

# Logical sizes from the PyTorch module.
H1 = 30
H2 = 20

# Padded (lane/sublane-aligned) sizes used inside the kernel.
IN_PAD = 8     # input feature axis padded to a sublane multiple
LANE = 128     # hidden / output axes padded to a full 128-lane vreg
TB_MAX = 256   # max batch-tile rows per grid step


def mlp_kernel(x_ref, w1_ref, b1_ref, w2_ref, b2_ref, w3_ref, b3_ref, o_ref):
    # fc1 + tanh  (padded hidden columns stay exactly 0: tanh(0 + 0) = 0)
    h = jnp.tanh(
        jnp.dot(x_ref[...], w1_ref[...], preferred_element_type=jnp.float32)
        + b1_ref[...])
    # fc2 + tanh
    h = jnp.tanh(
        jnp.dot(h, w2_ref[...], preferred_element_type=jnp.float32)
        + b2_ref[...])
    # fc3 (linear output) -- (TB, 128) store is lane-dense (unmasked vst)
    o_ref[...] = (
        jnp.dot(h, w3_ref[...], preferred_element_type=jnp.float32)
        + b3_ref[...])


def pad_params(w1, b1, w2, b2, w3, b3):
    """One-time (init-time) zero-padding of weights to aligned tiles.

    Weights are [in_features, out_features] (transpose of PyTorch layout).
    """
    in_dim = w1.shape[0]
    out_dim = w3.shape[1]
    w1p = jnp.zeros((IN_PAD, LANE), jnp.float32).at[:in_dim, :H1].set(w1)
    b1p = jnp.zeros((1, LANE), jnp.float32).at[0, :H1].set(b1)
    w2p = jnp.zeros((LANE, LANE), jnp.float32).at[:H1, :H2].set(w2)
    b2p = jnp.zeros((1, LANE), jnp.float32).at[0, :H2].set(b2)
    w3p = jnp.zeros((LANE, LANE), jnp.float32).at[:H2, :out_dim].set(w3)
    b3p = jnp.zeros((1, LANE), jnp.float32).at[0, :out_dim].set(b3)
    return w1p, b1p, w2p, b2p, w3p, b3p


@functools.partial(jax.jit, static_argnames=("out_dim",))
def net_forward(x, padded_params, out_dim):
    """x: (B, in_dim) f32. Returns (B, out_dim) f32."""
    w1p, b1p, w2p, b2p, w3p, b3p = padded_params
    B, in_dim = x.shape

    # Batch tile: one launch amortized over all rows; tiles stay KB-sized.
    if B >= TB_MAX:
        tb = TB_MAX
    else:
        tb = max(8, ((B + 7) // 8) * 8)
    n_tiles = pl.cdiv(B, tb)
    b_pad = n_tiles * tb

    # Pad batch rows (sliced off below) and the feature axis to IN_PAD.
    xp = jnp.zeros((b_pad, IN_PAD), jnp.float32).at[:B, :in_dim].set(x)

    out_padded = pl.pallas_call(
        mlp_kernel,
        out_shape=jax.ShapeDtypeStruct((b_pad, LANE), jnp.float32),
        grid=(n_tiles,),
        in_specs=[
            pl.BlockSpec((tb, IN_PAD), lambda i: (i, 0)),      # x: batch-tiled
            pl.BlockSpec((IN_PAD, LANE), lambda i: (0, 0)),    # w1: resident
            pl.BlockSpec((1, LANE), lambda i: (0, 0)),         # b1
            pl.BlockSpec((LANE, LANE), lambda i: (0, 0)),      # w2
            pl.BlockSpec((1, LANE), lambda i: (0, 0)),         # b2
            pl.BlockSpec((LANE, LANE), lambda i: (0, 0)),      # w3
            pl.BlockSpec((1, LANE), lambda i: (0, 0)),         # b3
        ],
        out_specs=pl.BlockSpec((tb, LANE), lambda i: (i, 0)),  # lane-dense out
        compiler_params=pltpu.CompilerParams(
            dimension_semantics=("parallel",)),
    )(xp, w1p, b1p, w2p, b2p, w3p, b3p)

    return out_padded[:B, :out_dim]


def reference_forward(x, w1, b1, w2, b2, w3, b3):
    h = jnp.tanh(x @ w1 + b1)
    h = jnp.tanh(h @ w2 + b2)
    return h @ w3 + b3


if __name__ == "__main__":
    key = jax.random.PRNGKey(0)
    ks = jax.random.split(key, 7)

    IN_DIM, OUT_DIM = 6, 4

    # weight.data.normal_(0, 1); biases small deterministic random values.
    w1 = jax.random.normal(ks[1], (IN_DIM, H1), dtype=jnp.float32)
    b1 = 0.1 * jax.random.normal(ks[2], (H1,), dtype=jnp.float32)
    w2 = jax.random.normal(ks[3], (H1, H2), dtype=jnp.float32)
    b2 = 0.1 * jax.random.normal(ks[4], (H2,), dtype=jnp.float32)
    w3 = jax.random.normal(ks[5], (H2, OUT_DIM), dtype=jnp.float32)
    b3 = 0.1 * jax.random.normal(ks[6], (OUT_DIM,), dtype=jnp.float32)

    padded = pad_params(w1, b1, w2, b2, w3, b3)

    # Small batch (single grid step).
    B = 32
    x = jax.random.normal(ks[0], (B, IN_DIM), dtype=jnp.float32)
    out = net_forward(x, padded, OUT_DIM)
    jax.block_until_ready(out)
    ref = reference_forward(x, w1, b1, w2, b2, w3, b3)
    assert out.shape == (B, OUT_DIM)
    assert jnp.allclose(out, ref, atol=1e-3, rtol=1e-3), "mismatch vs reference"

    # Larger, non-multiple batch to exercise the tiled grid + batch padding.
    B2 = 300
    x2 = jax.random.normal(jax.random.PRNGKey(1), (B2, IN_DIM), dtype=jnp.float32)
    out2 = net_forward(x2, padded, OUT_DIM)
    jax.block_until_ready(out2)
    ref2 = reference_forward(x2, w1, b1, w2, b2, w3, b3)
    assert out2.shape == (B2, OUT_DIM)
    assert jnp.allclose(out2, ref2, atol=1e-3, rtol=1e-3), "mismatch vs reference"

    print("KERNEL_OK")
</pallas_src>

<mosaic_0001>
module attributes {stable_mosaic.version = 11 : i64} {
  func.func @mlp_kernel(%arg0: i32, %arg1: memref<32x8xf32, #tpu.memory_space<vmem>>, %arg2: memref<8x128xf32, #tpu.memory_space<vmem>>, %arg3: memref<1x128xf32, #tpu.memory_space<vmem>>, %arg4: memref<128x128xf32, #tpu.memory_space<vmem>>, %arg5: memref<1x128xf32, #tpu.memory_space<vmem>>, %arg6: memref<128x128xf32, #tpu.memory_space<vmem>>, %arg7: memref<1x128xf32, #tpu.memory_space<vmem>>, %arg8: memref<32x128xf32, #tpu.memory_space<vmem>>) attributes {dimension_semantics = [#tpu.dimension_semantics<parallel>], iteration_bounds = array<i64: 1>, scalar_prefetch = 0 : i64, scratch_operands = 0 : i64, tpu.core_type = #tpu.core_type<tc>, window_params = [{transform_indices = @transform_0, window_bounds = array<i64: 32, 8>}, {pipeline_mode = #tpu.pipeline_mode<synchronous>, transform_indices = @transform_1, window_bounds = array<i64: 8, 128>}, {pipeline_mode = #tpu.pipeline_mode<synchronous>, transform_indices = @transform_2, window_bounds = array<i64: 1, 128>}, {pipeline_mode = #tpu.pipeline_mode<synchronous>, transform_indices = @transform_3, window_bounds = array<i64: 128, 128>}, {pipeline_mode = #tpu.pipeline_mode<synchronous>, transform_indices = @transform_4, window_bounds = array<i64: 1, 128>}, {pipeline_mode = #tpu.pipeline_mode<synchronous>, transform_indices = @transform_5, window_bounds = array<i64: 128, 128>}, {pipeline_mode = #tpu.pipeline_mode<synchronous>, transform_indices = @transform_6, window_bounds = array<i64: 1, 128>}, {transform_indices = @transform_7, window_bounds = array<i64: 32, 128>}]} {
    %c0 = arith.constant 0 : index
    %c0_0 = arith.constant 0 : index
    %0 = vector.load %arg1[%c0, %c0_0] : memref<32x8xf32, #tpu.memory_space<vmem>>, vector<32x8xf32>
    %c0_1 = arith.constant 0 : index
    %c0_2 = arith.constant 0 : index
    %1 = vector.load %arg2[%c0_1, %c0_2] : memref<8x128xf32, #tpu.memory_space<vmem>>, vector<8x128xf32>
    %cst = arith.constant dense<0.000000e+00> : vector<32x128xf32>
    %2 = tpu.matmul %0, %1, %cst {dimension_numbers = #tpu.dot_dimension_numbers<[1], [0], [0], [1], [0, 0, 1, 1], [], []>} : vector<32x8xf32>, vector<8x128xf32>, vector<32x128xf32> -> vector<32x128xf32>
    %c0_3 = arith.constant 0 : index
    %c0_4 = arith.constant 0 : index
    %3 = vector.load %arg3[%c0_3, %c0_4] : memref<1x128xf32, #tpu.memory_space<vmem>>, vector<1x128xf32>
    %4 = vector.broadcast %3 : vector<1x128xf32> to vector<32x128xf32>
    %5 = arith.addf %2, %4 : vector<32x128xf32>
    %6 = math.tanh %5 : vector<32x128xf32>
    %c0_5 = arith.constant 0 : index
    %c0_6 = arith.constant 0 : index
    %7 = vector.load %arg4[%c0_5, %c0_6] : memref<128x128xf32, #tpu.memory_space<vmem>>, vector<128x128xf32>
    %cst_7 = arith.constant dense<0.000000e+00> : vector<32x128xf32>
    %8 = tpu.matmul %6, %7, %cst_7 {dimension_numbers = #tpu.dot_dimension_numbers<[1], [0], [0], [1], [0, 0, 1, 1], [], []>} : vector<32x128xf32>, vector<128x128xf32>, vector<32x128xf32> -> vector<32x128xf32>
    %c0_8 = arith.constant 0 : index
    %c0_9 = arith.constant 0 : index
    %9 = vector.load %arg5[%c0_8, %c0_9] : memref<1x128xf32, #tpu.memory_space<vmem>>, vector<1x128xf32>
    %10 = vector.broadcast %9 : vector<1x128xf32> to vector<32x128xf32>
    %11 = arith.addf %8, %10 : vector<32x128xf32>
    %12 = math.tanh %11 : vector<32x128xf32>
    %c0_10 = arith.constant 0 : index
    %c0_11 = arith.constant 0 : index
    %13 = vector.load %arg6[%c0_10, %c0_11] : memref<128x128xf32, #tpu.memory_space<vmem>>, vector<128x128xf32>
    %cst_12 = arith.constant dense<0.000000e+00> : vector<32x128xf32>
    %14 = tpu.matmul %12, %13, %cst_12 {dimension_numbers = #tpu.dot_dimension_numbers<[1], [0], [0], [1], [0, 0, 1, 1], [], []>} : vector<32x128xf32>, vector<128x128xf32>, vector<32x128xf32> -> vector<32x128xf32>
    %c0_13 = arith.constant 0 : index
    %c0_14 = arith.constant 0 : index
    %15 = vector.load %arg7[%c0_13, %c0_14] : memref<1x128xf32, #tpu.memory_space<vmem>>, vector<1x128xf32>
    %16 = vector.broadcast %15 : vector<1x128xf32> to vector<32x128xf32>
    %17 = arith.addf %14, %16 : vector<32x128xf32>
    %c0_15 = arith.constant 0 : index
    %c0_16 = arith.constant 0 : index
    %18 = vector.load %arg8[%c0_15, %c0_16] : memref<32x128xf32, #tpu.memory_space<vmem>>, vector<32x128xf32>
    tpu.vector_store %arg8[%c0_15, %c0_16], %17 {strides = array<i32>} : memref<32x128xf32, #tpu.memory_space<vmem>>, vector<32x128xf32>,
    return
  }
  func.func @transform_0(%arg0: i32) -> (i32, i32) {
    %c0_i32 = arith.constant 0 : i32
    %c0_i32_0 = arith.constant 0 : i32
    return %arg0, %c0_i32 : i32, i32
  }
  func.func @transform_1(%arg0: i32) -> (i32, i32) {
    %c0_i32 = arith.constant 0 : i32
    %c0_i32_0 = arith.constant 0 : i32
    %c0_i32_1 = arith.constant 0 : i32
    return %c0_i32, %c0_i32_0 : i32, i32
  }
  func.func @transform_2(%arg0: i32) -> (i32, i32) {
    %c0_i32 = arith.constant 0 : i32
    %c0_i32_0 = arith.constant 0 : i32
    %c0_i32_1 = arith.constant 0 : i32
    return %c0_i32, %c0_i32_0 : i32, i32
  }
  func.func @transform_3(%arg0: i32) -> (i32, i32) {
    %c0_i32 = arith.constant 0 : i32
    %c0_i32_0 = arith.constant 0 : i32
    %c0_i32_1 = arith.constant 0 : i32
    return %c0_i32, %c0_i32_0 : i32, i32
  }
  func.func @transform_4(%arg0: i32) -> (i32, i32) {
    %c0_i32 = arith.constant 0 : i32
    %c0_i32_0 = arith.constant 0 : i32
    %c0_i32_1 = arith.constant 0 : i32
    return %c0_i32, %c0_i32_0 : i32, i32
  }
  func.func @transform_5(%arg0: i32) -> (i32, i32) {
    %c0_i32 = arith.constant 0 : i32
    %c0_i32_0 = arith.constant 0 : i32
    %c0_i32_1 = arith.constant 0 : i32
    return %c0_i32, %c0_i32_0 : i32, i32
  }
  func.func @transform_6(%arg0: i32) -> (i32, i32) {
    %c0_i32 = arith.constant 0 : i32
    %c0_i32_0 = arith.constant 0 : i32
    %c0_i32_1 = arith.constant 0 : i32
    return %c0_i32, %c0_i32_0 : i32, i32
  }
  func.func @transform_7(%arg0: i32) -> (i32, i32) {
    %c0_i32 = arith.constant 0 : i32
    %c0_i32_0 = arith.constant 0 : i32
    return %arg0, %c0_i32 : i32, i32
  }
}

</mosaic_0001>

<bundles_post_ra>
// kernel: net_forward.1
= control target key start
LH: loop header
LB: loop body
LE: loop exit
PB: predicated region body
PF: predicated region fallthrough
CT: control target
= control target key end

     0   :  { %12 = vsyncpa [#allocation3], 0  ;;  %s560_s24 = smov [#allocation2]   ;;  %s694_s0 = inlined_call_operand.vmem [shape: f32[32,8], index: 0, kind: input, shape index: {}]   ;;  %s695_s1 = inlined_call_operand.vmem [shape: f32[8,128], index: 1, kind: input, shape index: {}]   ;;  %s696_s2 = inlined_call_operand.vmem [shape: f32[1,128], index: 2, kind: input, shape index: {}]   ;;  %s697_s3 = inlined_call_operand.vmem [shape: f32[128,128], index: 3, kind: input, shape index: {}]   ;;  %s698_s4 = inlined_call_operand.vmem [shape: f32[1,128], index: 4, kind: input, shape index: {}]   ;;  %s699_s5 = inlined_call_operand.hbm [shape: f32[128,128], index: 5, kind: input, shape index: {}]   ;;  %s700_s6 = inlined_call_operand.vmem [shape: f32[1,128], index: 6, kind: input, shape index: {}]   ;;  %s701_s7 = inlined_call_operand.vmem [shape: f32[32,128], index: 7, kind: output, shape index: {}]  }
   0x1   :  { %s28_s25 = sshll.u32 %s560_s24, 4  ;;  %s29_s25 = int_to_ptr.vmem [resolvable:$true] %s28_s25 }
   0x2   :  { %s546_s26 = scalar_lea.vmem %s29_s25, 2048  ;;  %p551_p1 = scmp.lt.s32.totalorder %s29_s25, %s29_s25 }
   0x3   :  { %p547_p0 = scmp.ne.s32.totalorder %s29_s25, %s546_s26  ;;  %p552_p2 = scmp.lt.s32.totalorder %s546_s26, %s546_s26 }
   0x5   :  { %p553_p3 = por %p552_p2, %p551_p1 }
   0x7   :  { %p554_p4 = pnand %p553_p3, %p547_p0 }
   0x9   :  { %557 = shalt.err (!%p554_p4)
}
   0xa   :  { %s561_s27 = smov 128   ;;  %s562_s28 = smov 8  }
   0xb   :  { %34 = dma.hbm_to_vmem [thread:$0]  %s699_s5, 2048, %s29_s25, [#allocation3], %s561_s27, %s561_s27, %s562_s28  }
   0xc   :  { %558 = dma.done.wait [#allocation3], 2048  }
   0xd   :  { %559 = vsyncadd [#allocation3], 4294965248  ;;  %vm52_vm0 = vcmask 64512   ;;  %v44_v0 = vld [vmem:[%s695_s1] sm:$0xff]  ;;  %v41_v2 = vld [vmem:[%s694_s0 + $0x8] sm:$0xff] }
   0xe   :  { %v40_v1 = vld [vmem:[%s694_s0] sm:$0xff]  ;;  %435 = vmatprep.subr.mxu0 %v44_v0  ;;  %v42_v3 = vld [vmem:[%s694_s0 + $0x10] sm:$0xff]  ;;  %v169_v4 = vld [vmem:[%s697_s3 + $0x78] sm:$0xff] }
   0xf   :  { %437 = vmatprep.mubr.msk.f32.mxu0 %vm52_vm0, %v40_v1  ;;  %436 = vmatpush3.msra.mxu0 %v44_v0  ;;  %v168_v5 = vld [vmem:[%s697_s3 + $0x70] sm:$0xff]  ;;  %v167_v6 = vld [vmem:[%s697_s3 + $0x68] sm:$0xff]  ;;  %v43_v7 = vld [vmem:[%s694_s0 + $0x18] sm:$0xff] }
  0x10   :  { %443 = vmatprep.subr.mxu1 %v169_v4  ;;  %438 = vmatmul.mubr.msk.f32.vlgmr.msra.gmra.mxu0 %vm52_vm0, %v41_v2  ;;  %v166_v8 = vld [vmem:[%s697_s3 + $0x60] sm:$0xff]  ;;  %v165_v9 = vld [vmem:[%s697_s3 + $0x58] sm:$0xff]  ;;  %v164_v10 = vld [vmem:[%s697_s3 + $0x50] sm:$0xff] }
  0x11   :  { %444 = vmatpush3.msra.mxu1 %v169_v4  ;;  %440 = vmatprep.mubr.msk.f32.mxu0 %vm52_vm0, %v42_v3  ;;  %v163_v11 = vld [vmem:[%s697_s3 + $0x48] sm:$0xff]  ;;  %v162_v12 = vld [vmem:[%s697_s3 + $0x40] sm:$0xff]  ;;  %v161_v13 = vld [vmem:[%s697_s3 + $0x38] sm:$0xff] }
  0x12   :  { %445 = vmatprep.subr.mxu1 %v168_v5  ;;  %v160_v14 = vld [vmem:[%s697_s3 + $0x30] sm:$0xff]  ;;  %v159_v15 = vld [vmem:[%s697_s3 + $0x28] sm:$0xff]  ;;  %v158_v16 = vld [vmem:[%s697_s3 + $0x20] sm:$0xff] }
  0x13   :  { %446 = vmatpush3.msra.mxu1 %v168_v5  ;;  %v157_v17 = vld [vmem:[%s697_s3 + $0x18] sm:$0xff]  ;;  %v156_v18 = vld [vmem:[%s697_s3 + $0x10] sm:$0xff]  ;;  %v155_v19 = vld [vmem:[%s697_s3 + $0x8] sm:$0xff] }
  0x14   :  { %447 = vmatprep.subr.mxu1 %v167_v6  ;;  %441 = vmatmul.mubr.msk.f32.gmra.mxu0 %vm52_vm0, %v43_v7  ;;  %v154_v20 = vld [vmem:[%s697_s3] sm:$0xff]  ;;  %v281_v21 = vld [vmem:[#allocation2 + $0x78] sm:$0xff]  ;;  %v280_v22 = vld [vmem:[#allocation2 + $0x70] sm:$0xff] }
  0x15   :  { %448 = vmatpush3.msra.mxu1 %v167_v6  ;;  %481 = vmatprep.subr.mxu0 %v281_v21  ;;  %v279_v23 = vld [vmem:[#allocation2 + $0x68] sm:$0xff]  ;;  %v278_v24 = vld [vmem:[#allocation2 + $0x60] sm:$0xff]  ;;  %v277_v25 = vld [vmem:[#allocation2 + $0x58] sm:$0xff] }
  0x16   :  { %449 = vmatprep.subr.mxu1 %v166_v8  ;;  %482 = vmatpush3.msra.mxu0 %v281_v21  ;;  %v276_v26 = vld [vmem:[#allocation2 + $0x50] sm:$0xff]  ;;  %v383_v27 = vld [vmem:[%s696_s2] ss:$0 sm:$0xff]  ;;  %v275_v40 = vld [vmem:[#allocation2 + $0x48] sm:$0xff] }
  0x17   :  { %450 = vmatpush3.msra.mxu1 %v166_v8  ;;  %483 = vmatprep.subr.mxu0 %v280_v22  ;;  %v274_v41 = vld [vmem:[#allocation2 + $0x40] sm:$0xff]  ;;  %v273_v42 = vld [vmem:[#allocation2 + $0x38] sm:$0xff]  ;;  %v272_v43 = vld [vmem:[#allocation2 + $0x30] sm:$0xff] }
  0x18   :  { %451 = vmatprep.subr.mxu1 %v165_v9  ;;  %484 = vmatpush3.msra.mxu0 %v280_v22  ;;  %v271_v44 = vld [vmem:[#allocation2 + $0x28] sm:$0xff]  ;;  %v270_v45 = vld [vmem:[#allocation2 + $0x20] sm:$0xff]  ;;  %v269_v46 = vld [vmem:[#allocation2 + $0x18] sm:$0xff] }
  0x19   :  { %452 = vmatpush3.msra.mxu1 %v165_v9  ;;  %485 = vmatprep.subr.mxu0 %v279_v23  ;;  %v268_v47 = vld [vmem:[#allocation2 + $0x10] sm:$0xff]  ;;  %v267_v48 = vld [vmem:[#allocation2 + $0x8] sm:$0xff]  ;;  %v266_v49 = vld [vmem:[#allocation2] sm:$0xff] }
  0x1a   :  { %453 = vmatprep.subr.mxu1 %v164_v10  ;;  %486 = vmatpush3.msra.mxu0 %v279_v23  ;;  %v388_v50 = vld [vmem:[%s698_s4] ss:$0 sm:$0xff] }
  0x1b   :  { %454 = vmatpush3.msra.mxu1 %v164_v10  ;;  %487 = vmatprep.subr.mxu0 %v278_v24  ;;  %v389_v63 = vld [vmem:[%s700_s6] ss:$0 sm:$0xff] }
  0x1c   :  { %455 = vmatprep.subr.mxu1 %v163_v11  ;;  %488 = vmatpush3.msra.mxu0 %v278_v24 }
  0x1d   :  { %456 = vmatpush3.msra.mxu1 %v163_v11  ;;  %489 = vmatprep.subr.mxu0 %v277_v25 }
  0x1e   :  { %457 = vmatprep.subr.mxu1 %v162_v12  ;;  %490 = vmatpush3.msra.mxu0 %v277_v25 }
  0x1f   :  { %458 = vmatpush3.msra.mxu1 %v162_v12  ;;  %491 = vmatprep.subr.mxu0 %v276_v26 }
  0x20   :  { %459 = vmatprep.subr.mxu1 %v161_v13  ;;  %492 = vmatpush3.msra.mxu0 %v276_v26 }
  0x21   :  { %460 = vmatpush3.msra.mxu1 %v161_v13  ;;  %493 = vmatprep.subr.mxu0 %v275_v40 }
  0x22   :  { %461 = vmatprep.subr.mxu1 %v160_v14  ;;  %494 = vmatpush3.msra.mxu0 %v275_v40 }
  0x23   :  { %462 = vmatpush3.msra.mxu1 %v160_v14  ;;  %495 = vmatprep.subr.mxu0 %v274_v41 }
  0x24   :  { %463 = vmatprep.subr.mxu1 %v159_v15  ;;  %496 = vmatpush3.msra.mxu0 %v274_v41 }
  0x25   :  { %464 = vmatpush3.msra.mxu1 %v159_v15  ;;  %497 = vmatprep.subr.mxu0 %v273_v42 }
  0x26   :  { %465 = vmatprep.subr.mxu1 %v158_v16  ;;  %498 = vmatpush3.msra.mxu0 %v273_v42 }
  0x27   :  { %466 = vmatpush3.msra.mxu1 %v158_v16  ;;  %499 = vmatprep.subr.mxu0 %v272_v43 }
  0x28   :  { %467 = vmatprep.subr.mxu1 %v157_v17  ;;  %500 = vmatpush3.msra.mxu0 %v272_v43 }
  0x29   :  { %468 = vmatpush3.msra.mxu1 %v157_v17  ;;  %501 = vmatprep.subr.mxu0 %v271_v44 }
  0x2a   :  { %469 = vmatprep.subr.mxu1 %v156_v18  ;;  %502 = vmatpush3.msra.mxu0 %v271_v44 }
  0x2b   :  { %470 = vmatpush3.msra.mxu1 %v156_v18  ;;  %503 = vmatprep.subr.mxu0 %v270_v45 }
  0x2c   :  { %471 = vmatprep.subr.mxu1 %v155_v19  ;;  %504 = vmatpush3.msra.mxu0 %v270_v45 }
  0x2d   :  { %472 = vmatpush3.msra.mxu1 %v155_v19  ;;  %505 = vmatprep.subr.mxu0 %v269_v46 }
  0x2e   :  { %473 = vmatprep.subr.mxu1 %v154_v20  ;;  %506 = vmatpush3.msra.mxu0 %v269_v46 }
  0x2f   :  { %474 = vmatpush3.msra.mxu1 %v154_v20  ;;  %507 = vmatprep.subr.mxu0 %v268_v47 }
  0x30   :  { %508 = vmatpush3.msra.mxu0 %v268_v47 }
  0x31   :  { %509 = vmatprep.subr.mxu0 %v267_v48 }
  0x32   :  { %510 = vmatpush3.msra.mxu0 %v267_v48 }
  0x33   :  { %511 = vmatprep.subr.mxu0 %v266_v49 }
  0x34   :  { %512 = vmatpush3.msra.mxu0 %v266_v49 }
  0xd0   :  { %v439_v28 = vpop.f32.mrf.mxu0 }
  0xd1   :  { %v137_v29 = vadd.f32 %v439_v28, %v383_v27 }
  0xd2   :  { %v131_v30 = vpop.f32.mrf.mxu0 }
  0xd3   :  { %v132_v31 = vadd.f32 %v383_v27, %v131_v30 }
  0xd4   :  { %v442_v32 = vpop.f32.mrf.mxu0 }
  0xd5   :  { %522 = vtanh.f32 %v132_v31  ;;  %v147_v33 = vadd.f32 %v442_v32, %v383_v27 }
  0xd6   :  { %524 = vtanh.f32 %v137_v29  ;;  %v141_v34 = vpop.f32.mrf.mxu0 }
  0xd7   :  { %v142_v35 = vadd.f32 %v383_v27, %v141_v34 }
  0xd9   :  { %526 = vtanh.f32 %v142_v35 }
  0xda   :  { %528 = vtanh.f32 %v147_v33 }
  0xe2   :  { %v523_v36 = vpop.eup %522 }
  0xe3   :  { %v525_v37 = vpop.eup %524  ;;  %475 = vmatprep.mubr.f32.mxu1 %v523_v36 }
  0xe4   :  { %476 = vmatmul.mubr.f32.vlgmr.msra.gmra.mxu1 %v525_v37 }
  0xe6   :  { %v527_v38 = vpop.eup %526 }
  0xe7   :  { %v529_v39 = vpop.eup %528  ;;  %478 = vmatprep.mubr.f32.mxu1 %v527_v38 }
  0xe8   :  { %479 = vmatmul.mubr.f32.gmra.mxu1 %v529_v39 }
 0x1a4   :  { %v477_v51 = vpop.f32.mrf.mxu1 }
 0x1a5   :  { %v249_v52 = vadd.f32 %v477_v51, %v388_v50 }
 0x1a6   :  { %v243_v53 = vpop.f32.mrf.mxu1 }
 0x1a7   :  { %v244_v54 = vadd.f32 %v388_v50, %v243_v53 }
 0x1a8   :  { %v480_v55 = vpop.f32.mrf.mxu1 }
 0x1a9   :  { %530 = vtanh.f32 %v244_v54  ;;  %v259_v56 = vadd.f32 %v480_v55, %v388_v50 }
 0x1aa   :  { %532 = vtanh.f32 %v249_v52  ;;  %v253_v57 = vpop.f32.mrf.mxu1 }
 0x1ab   :  { %v254_v58 = vadd.f32 %v388_v50, %v253_v57 }
 0x1ad   :  { %534 = vtanh.f32 %v254_v58 }
 0x1ae   :  { %536 = vtanh.f32 %v259_v56 }
 0x1b6   :  { %v531_v59 = vpop.eup %530 }
 0x1b7   :  { %v533_v60 = vpop.eup %532  ;;  %513 = vmatprep.mubr.f32.mxu0 %v531_v59 }
 0x1b8   :  { %514 = vmatmul.mubr.f32.vlgmr.msra.gmra.mxu0 %v533_v60 }
 0x1ba   :  { %v535_v61 = vpop.eup %534 }
 0x1bb   :  { %v537_v62 = vpop.eup %536  ;;  %516 = vmatprep.mubr.f32.mxu0 %v535_v61 }
 0x1bc   :  { %517 = vmatmul.mubr.f32.gmra.mxu0 %v537_v62 }
 0x278   :  { %v515_v0 = vpop.f32.mrf.mxu0 }
 0x279   :  { %v361_v1 = vadd.f32 %v515_v0, %v389_v63 }
 0x27a   :  { %v355_v2 = vpop.f32.mrf.mxu0 }
 0x27b   :  { %375 = vst [vmem:[%s701_s7 + $0x8] sm:$0xff] %v361_v1  ;;  %v356_v3 = vadd.f32 %v389_v63, %v355_v2 }
 0x27c   :  { %v518_v4 = vpop.f32.mrf.mxu0 }
 0x27d   :  { %374 = vst [vmem:[%s701_s7] sm:$0xff] %v356_v3  ;;  %v371_v5 = vadd.f32 %v518_v4, %v389_v63 }
 0x27e   :  { %v365_v6 = vpop.f32.mrf.mxu0 }
 0x27f   :  { %377 = vst [vmem:[%s701_s7 + $0x18] sm:$0xff] %v371_v5  ;;  %v366_v7 = vadd.f32 %v389_v63, %v365_v6 }
 0x281   :  { %376 = vst [vmem:[%s701_s7 + $0x10] sm:$0xff] %v366_v7 }
 0x282   :  { %382 = vsyncpa [#allocation3], 1 }

</bundles_post_ra>
